<compile_context>
chip_gen: v6e
topology: v6e:2x2x1
jax: 0.10.0
libtpu: 0.0.40
codegen_flags: <defaults>
</compile_context>

<pallas_src>
import jax
import jax.numpy as jnp
from jax import lax
from jax.experimental import pallas as pl
from jax.experimental.pallas import tpu as pltpu


# --------------------------------------------------------------------------
# Pallas kernel: fused Linear -> SiLU -> Linear -> SiLU -> Linear
# --------------------------------------------------------------------------
def _mlp_head_kernel(x_ref, w1_ref, b1_ref, w2_ref, b2_ref, w3_ref, b3_ref, o_ref):
    # x: (TM, E) bf16 token embeddings -- the HBM-bound operand.
    x = x_ref[...]

    # Linear(E, H) + SiLU   (bf16 MXU matmul, f32 accumulate; elementwise in f32)
    h1 = jnp.dot(x, w1_ref[...], preferred_element_type=jnp.float32) + b1_ref[...]
    h1 = h1 * jax.nn.sigmoid(h1)

    # (Dropout == identity at inference)

    # Linear(H, H//2) + SiLU  (weights tiny + resident in VMEM)
    h2 = jnp.dot(h1, w2_ref[...], preferred_element_type=jnp.float32) + b2_ref[...]
    h2 = h2 * jax.nn.sigmoid(h2)

    # Linear(H//2, 1): contract w3 (1,H2) with h2 (TM,H2) over H2 -> (1, TM).
    # Produces the per-token logits directly in lane-dense row layout, so the
    # store is a full (1, TM) vector store instead of TM masked 1-lane stores.
    out = lax.dot_general(
        w3_ref[...], h2,
        dimension_numbers=(((1,), (1,)), ((), ())),
        preferred_element_type=jnp.float32,
    ) + b3_ref[0]                                   # b3 is an SMEM scalar

    o_ref[...] = out[None].astype(o_ref.dtype)      # (1, 1, TM)


def _choose_tile_m(n_rows: int, emb_dim: int) -> int:
    """Pick a row-tile (multiple of 128) sized against VMEM and the workload."""
    tile = 1024
    # Keep the double-buffered bf16 x block well inside scoped VMEM on every
    # generation (v7x: 64 MiB physical / 32 MiB default-scoped).
    while tile > 128 and 2 * tile * emb_dim * 2 > (16 << 20):
        tile //= 2
    # Avoid over-padding tiny inputs and keep grid >= 2 when there is enough
    # work so v7x's two TensorCores both get a share of the parallel grid axis.
    while tile > 128 and n_rows <= tile:
        tile //= 2
    return tile


def epitope_head_pallas(x_flat, w1, b1, w2, b2, w3, b3, *, tile_m=None):
    """x_flat: (R, E) embeddings.  Returns (R, 1) float32 logits."""
    R, E = x_flat.shape
    H = w1.shape[1]
    H2 = w2.shape[1]

    # bf16 read path for the dominant HBM traffic (embeddings + W1).
    x_flat = x_flat.astype(jnp.bfloat16)
    w1 = w1.astype(jnp.bfloat16)

    if tile_m is None:
        tile_m = _choose_tile_m(R, E)
    num_tiles = pl.cdiv(R, tile_m)
    r_pad = num_tiles * tile_m
    if r_pad != R:
        # Padded rows are garbage-in/garbage-out and are sliced off below.
        x_flat = jnp.pad(x_flat, ((0, r_pad - R), (0, 0)))

    # Explicit VMEM budget: double-buffered x block + output blocks + weights.
    vmem_est = 2 * tile_m * E * 2            # x (bf16, double-buffered)
    vmem_est += 2 * tile_m * 4               # output row blocks (f32)
    vmem_est += 2 * 4 * (E * H + H * H2 + H + H2 + H2)   # resident params (padded, 2 bufs)
    vmem_limit = int(min(max(3 * vmem_est // 2 + (2 << 20), 16 << 20), 48 << 20))

    full = lambda i: (0, 0)   # resident params: same block for every grid step

    out = pl.pallas_call(
        _mlp_head_kernel,
        out_shape=jax.ShapeDtypeStruct((num_tiles, 1, tile_m), jnp.float32),
        grid_spec=pltpu.PrefetchScalarGridSpec(
            num_scalar_prefetch=0,
            grid=(num_tiles,),
            in_specs=[
                pl.BlockSpec((tile_m, E), lambda i: (i, 0)),          # x rows (streamed)
                pl.BlockSpec((E, H), full),                           # W1 (bf16)
                pl.BlockSpec((1, H), full),                           # b1
                pl.BlockSpec((H, H2), full),                          # W2
                pl.BlockSpec((1, H2), full),                          # b2
                pl.BlockSpec((1, H2), full),                          # W3 (row form)
                pl.BlockSpec(memory_space=pltpu.MemorySpace.SMEM),    # b3 scalar
            ],
            out_specs=pl.BlockSpec((1, 1, tile_m), lambda i: (i, 0, 0)),
        ),
        compiler_params=pltpu.CompilerParams(
            dimension_semantics=("parallel",),
            vmem_limit_bytes=vmem_limit,
        ),
    )(x_flat, w1, b1, w2, b2, w3, b3)

    # (num_tiles, 1, tile_m) row-major == original row order; drop padding.
    return out.reshape(r_pad, 1)[:R]


# --------------------------------------------------------------------------
# EpitopeModel wrapper (inference)
# --------------------------------------------------------------------------
class EpitopeModelPallas:
    def __init__(self, embedding_dim: int, hidden_dim: int = 256, seed: int = 0):
        self.embedding_dim = embedding_dim
        self.hidden_dim = hidden_dim
        key = jax.random.PRNGKey(seed)
        ks = jax.random.split(key, 6)

        def linear_init(kw, kb, fan_in, shape_w, shape_b):
            # PyTorch nn.Linear default init: U(-1/sqrt(fan_in), 1/sqrt(fan_in))
            bound = 1.0 / jnp.sqrt(fan_in)
            w = jax.random.uniform(kw, shape_w, jnp.float32, -bound, bound)
            b = jax.random.uniform(kb, shape_b, jnp.float32, -bound, bound)
            return w, b

        E, H = embedding_dim, hidden_dim
        H2 = H // 2
        self.w1, self.b1 = linear_init(ks[0], ks[1], E, (E, H), (1, H))
        self.w2, self.b2 = linear_init(ks[2], ks[3], H, (H, H2), (1, H2))
        # final layer kept in row form (1, H2) (== torch Linear weight layout)
        self.w3, self.b3 = linear_init(ks[4], ks[5], H2, (1, H2), (1,))

    def __call__(self, embeddings, coords=None, mask=None, rho=None):
        # TODO(synk): the frozen ESM language-model embedder is an external
        # pretrained network; `embeddings` stands in for its representations.
        # coords / mask / rho are unused with the module's default flags
        # (use_rho=use_egnn=use_transformer=use_se3_transformer=False).
        B, L, E = embeddings.shape
        x_flat = embeddings.reshape(B * L, E)
        out = epitope_head_pallas(
            x_flat, self.w1, self.b1, self.w2, self.b2, self.w3, self.b3
        )
        return out.reshape(B, L, 1)


def _reference_head(model, embeddings):
    B, L, E = embeddings.shape
    hp = jax.lax.Precision.HIGHEST
    # mirror the kernel's bf16 read path for x / W1, everything else f32
    x = embeddings.reshape(B * L, E).astype(jnp.bfloat16).astype(jnp.float32)
    w1 = model.w1.astype(jnp.bfloat16).astype(jnp.float32)
    h1 = jnp.dot(x, w1, precision=hp) + model.b1
    h1 = h1 * jax.nn.sigmoid(h1)
    h2 = jnp.dot(h1, model.w2, precision=hp) + model.b2
    h2 = h2 * jax.nn.sigmoid(h2)
    out = jnp.dot(h2, model.w3.T, precision=hp) + model.b3
    return out.reshape(B, L, 1)


# --------------------------------------------------------------------------
if __name__ == "__main__":
    B, L, E, H = 2, 8, 32, 64  # small shapes: batch, seq, embedding_dim, hidden_dim

    key = jax.random.PRNGKey(0)
    k_emb, k_coords, k_rho = jax.random.split(key, 3)
    embeddings = jax.random.normal(k_emb, (B, L, E), dtype=jnp.float32)
    coords = jax.random.normal(k_coords, (B, L, 3), dtype=jnp.float32)   # unused
    mask = jnp.ones((B, L), dtype=jnp.bool_)                             # unused
    rho = jax.random.normal(k_rho, (B, L, 5), dtype=jnp.float32)         # unused

    model = EpitopeModelPallas(embedding_dim=E, hidden_dim=H, seed=0)

    out = model(embeddings, coords, mask, rho)
    out = jax.block_until_ready(out)
    ref = _reference_head(model, embeddings)
    assert out.shape == (B, L, 1)
    assert jnp.allclose(out, ref, atol=1e-2, rtol=1e-2), "mismatch vs JAX reference"

    # second shape: exercises row padding + a multi-tile parallel grid
    emb2 = jax.random.normal(jax.random.PRNGKey(1), (2, 200, E), dtype=jnp.float32)
    out2 = jax.block_until_ready(model(emb2))
    ref2 = _reference_head(model, emb2)
    assert out2.shape == (2, 200, 1)
    assert jnp.allclose(out2, ref2, atol=1e-2, rtol=1e-2), "mismatch (padded grid)"

    print("KERNEL_OK")
</pallas_src>

<mosaic_0001>
module attributes {stable_mosaic.version = 11 : i64} {
  func.func @_mlp_head_kernel(%arg0: i32, %arg1: memref<128x32xbf16, #tpu.memory_space<vmem>>, %arg2: memref<32x64xbf16, #tpu.memory_space<vmem>>, %arg3: memref<1x64xf32, #tpu.memory_space<vmem>>, %arg4: memref<64x32xf32, #tpu.memory_space<vmem>>, %arg5: memref<1x32xf32, #tpu.memory_space<vmem>>, %arg6: memref<1x32xf32, #tpu.memory_space<vmem>>, %arg7: memref<1xf32, #tpu.memory_space<smem>>, %arg8: memref<1x1x128xf32, #tpu.memory_space<vmem>>) attributes {dimension_semantics = [#tpu.dimension_semantics<parallel>], iteration_bounds = array<i64: 1>, scalar_prefetch = 0 : i64, scratch_operands = 0 : i64, tpu.core_type = #tpu.core_type<tc>, window_params = [{transform_indices = @transform_0, window_bounds = array<i64: 128, 32>}, {pipeline_mode = #tpu.pipeline_mode<synchronous>, transform_indices = @transform_1, window_bounds = array<i64: 32, 64>}, {pipeline_mode = #tpu.pipeline_mode<synchronous>, transform_indices = @transform_2, window_bounds = array<i64: 1, 64>}, {pipeline_mode = #tpu.pipeline_mode<synchronous>, transform_indices = @transform_3, window_bounds = array<i64: 64, 32>}, {pipeline_mode = #tpu.pipeline_mode<synchronous>, transform_indices = @transform_4, window_bounds = array<i64: 1, 32>}, {pipeline_mode = #tpu.pipeline_mode<synchronous>, transform_indices = @transform_5, window_bounds = array<i64: 1, 32>}, {transform_indices = @transform_6, window_bounds = array<i64: 1>}, {transform_indices = @transform_7, window_bounds = array<i64: 1, 1, 128>}]} {
    %c0 = arith.constant 0 : index
    %c0_0 = arith.constant 0 : index
    %0 = vector.load %arg1[%c0, %c0_0] : memref<128x32xbf16, #tpu.memory_space<vmem>>, vector<128x32xbf16>
    %c0_1 = arith.constant 0 : index
    %c0_2 = arith.constant 0 : index
    %1 = vector.load %arg2[%c0_1, %c0_2] : memref<32x64xbf16, #tpu.memory_space<vmem>>, vector<32x64xbf16>
    %cst = arith.constant dense<0.000000e+00> : vector<128x64xf32>
    %2 = tpu.matmul %0, %1, %cst {dimension_numbers = #tpu.dot_dimension_numbers<[1], [0], [0], [1], [0, 0, 1, 1], [], []>} : vector<128x32xbf16>, vector<32x64xbf16>, vector<128x64xf32> -> vector<128x64xf32>
    %c0_3 = arith.constant 0 : index
    %c0_4 = arith.constant 0 : index
    %3 = vector.load %arg3[%c0_3, %c0_4] : memref<1x64xf32, #tpu.memory_space<vmem>>, vector<1x64xf32>
    %4 = vector.broadcast %3 : vector<1x64xf32> to vector<128x64xf32>
    %5 = arith.addf %2, %4 : vector<128x64xf32>
    %6 = arith.negf %5 : vector<128x64xf32>
    %7 = math.exp %6 : vector<128x64xf32>
    %cst_5 = arith.constant 1.000000e+00 : f32
    %8 = vector.broadcast %cst_5 : f32 to vector<128x64xf32>
    %9 = arith.addf %8, %7 : vector<128x64xf32>
    %10 = arith.divf %8, %9 : vector<128x64xf32>
    %11 = arith.mulf %5, %10 : vector<128x64xf32>
    %c0_6 = arith.constant 0 : index
    %c0_7 = arith.constant 0 : index
    %12 = vector.load %arg4[%c0_6, %c0_7] : memref<64x32xf32, #tpu.memory_space<vmem>>, vector<64x32xf32>
    %cst_8 = arith.constant dense<0.000000e+00> : vector<128x32xf32>
    %13 = tpu.matmul %11, %12, %cst_8 {dimension_numbers = #tpu.dot_dimension_numbers<[1], [0], [0], [1], [0, 0, 1, 1], [], []>} : vector<128x64xf32>, vector<64x32xf32>, vector<128x32xf32> -> vector<128x32xf32>
    %c0_9 = arith.constant 0 : index
    %c0_10 = arith.constant 0 : index
    %14 = vector.load %arg5[%c0_9, %c0_10] : memref<1x32xf32, #tpu.memory_space<vmem>>, vector<1x32xf32>
    %15 = vector.broadcast %14 : vector<1x32xf32> to vector<128x32xf32>
    %16 = arith.addf %13, %15 : vector<128x32xf32>
    %17 = arith.negf %16 : vector<128x32xf32>
    %18 = math.exp %17 : vector<128x32xf32>
    %cst_11 = arith.constant 1.000000e+00 : f32
    %19 = vector.broadcast %cst_11 : f32 to vector<128x32xf32>
    %20 = arith.addf %19, %18 : vector<128x32xf32>
    %21 = arith.divf %19, %20 : vector<128x32xf32>
    %22 = arith.mulf %16, %21 : vector<128x32xf32>
    %c0_12 = arith.constant 0 : index
    %c0_13 = arith.constant 0 : index
    %23 = vector.load %arg6[%c0_12, %c0_13] : memref<1x32xf32, #tpu.memory_space<vmem>>, vector<1x32xf32>
    %cst_14 = arith.constant dense<0.000000e+00> : vector<1x128xf32>
    %24 = tpu.matmul %23, %22, %cst_14 {dimension_numbers = #tpu.dot_dimension_numbers<[1], [1], [0], [0], [0, 0, 1, 0], [], []>} : vector<1x32xf32>, vector<128x32xf32>, vector<1x128xf32> -> vector<1x128xf32>
    %c0_15 = arith.constant 0 : index
    %25 = memref.load %arg7[%c0_15] : memref<1xf32, #tpu.memory_space<smem>>
    %26 = vector.broadcast %25 : f32 to vector<1x128xf32>
    %27 = arith.addf %24, %26 : vector<1x128xf32>
    %28 = vector.shape_cast %27 : vector<1x128xf32> to vector<1x1x128xf32>
    %c0_16 = arith.constant 0 : index
    %c0_17 = arith.constant 0 : index
    %c0_18 = arith.constant 0 : index
    %29 = vector.load %arg8[%c0_16, %c0_17, %c0_18] : memref<1x1x128xf32, #tpu.memory_space<vmem>>, vector<1x1x128xf32>
    tpu.vector_store %arg8[%c0_16, %c0_17, %c0_18], %28 {strides = array<i32>} : memref<1x1x128xf32, #tpu.memory_space<vmem>>, vector<1x1x128xf32>,
    return
  }
  func.func @transform_0(%arg0: i32) -> (i32, i32) {
    %c0_i32 = arith.constant 0 : i32
    %c0_i32_0 = arith.constant 0 : i32
    return %arg0, %c0_i32 : i32, i32
  }
  func.func @transform_1(%arg0: i32) -> (i32, i32) {
    %c0_i32 = arith.constant 0 : i32
    %c0_i32_0 = arith.constant 0 : i32
    %c0_i32_1 = arith.constant 0 : i32
    return %c0_i32, %c0_i32_0 : i32, i32
  }
  func.func @transform_2(%arg0: i32) -> (i32, i32) {
    %c0_i32 = arith.constant 0 : i32
    %c0_i32_0 = arith.constant 0 : i32
    %c0_i32_1 = arith.constant 0 : i32
    return %c0_i32, %c0_i32_0 : i32, i32
  }
  func.func @transform_3(%arg0: i32) -> (i32, i32) {
    %c0_i32 = arith.constant 0 : i32
    %c0_i32_0 = arith.constant 0 : i32
    %c0_i32_1 = arith.constant 0 : i32
    return %c0_i32, %c0_i32_0 : i32, i32
  }
  func.func @transform_4(%arg0: i32) -> (i32, i32) {
    %c0_i32 = arith.constant 0 : i32
    %c0_i32_0 = arith.constant 0 : i32
    %c0_i32_1 = arith.constant 0 : i32
    return %c0_i32, %c0_i32_0 : i32, i32
  }
  func.func @transform_5(%arg0: i32) -> (i32, i32) {
    %c0_i32 = arith.constant 0 : i32
    %c0_i32_0 = arith.constant 0 : i32
    %c0_i32_1 = arith.constant 0 : i32
    return %c0_i32, %c0_i32_0 : i32, i32
  }
  func.func @transform_6(%arg0: i32) -> i32 {
    %c0_i32 = arith.constant 0 : i32
    %c0_i32_0 = arith.constant 0 : i32
    return %c0_i32 : i32
  }
  func.func @transform_7(%arg0: i32) -> (i32, i32, i32) {
    %c0_i32 = arith.constant 0 : i32
    %c0_i32_0 = arith.constant 0 : i32
    %c0_i32_1 = arith.constant 0 : i32
    return %arg0, %c0_i32, %c0_i32_0 : i32, i32, i32
  }
}

</mosaic_0001>

<bundles_post_ra>
// kernel: tpu_custom_call.1
= control target key start
LH: loop header
LB: loop body
LE: loop exit
PB: predicated region body
PF: predicated region fallthrough
CT: control target
= control target key end

     0   :  { %vm108_vm0 = vcmask 261120   ;;  %s1534_s0 = inlined_call_operand.vmem [shape: bf16[128,32], index: 0, kind: input, shape index: {}]   ;;  %s1535_s1 = inlined_call_operand.vmem [shape: bf16[32,64], index: 1, kind: input, shape index: {}]   ;;  %s1536_s2 = inlined_call_operand.vmem [shape: f32[1,64], index: 2, kind: input, shape index: {}]   ;;  %s1537_s3 = inlined_call_operand.vmem [shape: f32[64,32], index: 3, kind: input, shape index: {}]   ;;  %s1538_s4 = inlined_call_operand.vmem [shape: f32[1,32], index: 4, kind: input, shape index: {}]   ;;  %s1539_s5 = inlined_call_operand.vmem [shape: f32[1,32], index: 5, kind: input, shape index: {}]   ;;  %s1540_s6 = inlined_call_operand.<no memory space> [shape: f32[1], index: 6, kind: input, shape index: {}]   ;;  %s1541_s7 = inlined_call_operand.hbm [shape: f32[1,1,128], index: 7, kind: output, shape index: {}]  }
   0x1   :  { %v1036_v0 = vld [vmem:[%s1535_s1 + $0x8] sm:$0xff]   ;;  %v1037_v1 = vld [vmem:[%s1535_s1] sm:$0xff]   ;;  %v1040_v4 = vld [vmem:[%s1534_s0 + $0x10] sm:$0xff]  }
   0x2   :  { %938 = vmatprep.subr.bf16.mxu1 %v1036_v0  ;;  %v1038_v2 = vld [vmem:[%s1534_s0] sm:$0xff]   ;;  %v1039_v3 = vld [vmem:[%s1534_s0 + $0x8] sm:$0xff]  }
   0x3   :  { %939 = vmatpush3.bf16.msra.mxu1 %v1036_v0  ;;  %942 = vmatprep.mubr.msk.bf16.mxu1 %vm108_vm0, %v1038_v2 }
   0x4   :  { %940 = vmatprep.subr.bf16.mxu1 %v1037_v1 }
   0x7   :  { %941 = vmatpush3.bf16.msra.mxu1 %v1037_v1 }
   0xa   :  { %943 = vmatmul.mubr.msk.bf16.vlgmr.msra.gmra.mxu1 %vm108_vm0, %v1039_v3 }
   0xb   :  { %13 = vsyncpa [#allocation4], 0  ;;  %946 = vmatprep.mubr.msk.bf16.mxu1 %vm108_vm0, %v1040_v4  ;;  %v1041_v5 = vld [vmem:[%s1534_s0 + $0x18] sm:$0xff]   ;;  %v1042_v6 = vld [vmem:[%s1534_s0 + $0x20] sm:$0xff]   ;;  %vm357_vm1 = vcmask 523264   ;;  %vm1197_vm2 = vmmov 0  }
   0xc   :  { %v1043_v7 = vld [vmem:[%s1534_s0 + $0x28] sm:$0xff]   ;;  %v1044_v8 = vld [vmem:[%s1534_s0 + $0x30] sm:$0xff]   ;;  %v1045_v9 = vld [vmem:[%s1534_s0 + $0x38] sm:$0xff]   ;;  %s1198_s16 = smov [#allocation3]  }
   0xd   :  { %v349_v10 = vld [vmem:[%s1537_s3 + $0x38] sm:$0xff]  ;;  %v348_v11 = vld [vmem:[%s1537_s3 + $0x30] sm:$0xff]  ;;  %v347_v12 = vld [vmem:[%s1537_s3 + $0x28] sm:$0xff]  ;;  %s794_s17 = sshll.u32 %s1198_s16, 4  ;;  %s795_s17 = int_to_ptr.vmem [resolvable:$true] %s794_s17 }
   0xe   :  { %958 = vmatprep.subr.mxu1 %v349_v10  ;;  %v346_v13 = vld [vmem:[%s1537_s3 + $0x20] sm:$0xff]  ;;  %v345_v14 = vld [vmem:[%s1537_s3 + $0x18] sm:$0xff]  ;;  %v344_v15 = vld [vmem:[%s1537_s3 + $0x10] sm:$0xff]  ;;  %s1174_s18 = scalar_lea.vmem %s795_s17, 16  ;;  %s1178_s19 = scalar_lea.vmem %s795_s17, 32 }
   0xf   :  { %959 = vmatpush3.msra.mxu1 %v349_v10  ;;  %v343_v16 = vld [vmem:[%s1537_s3 + $0x8] sm:$0xff]  ;;  %v342_v17 = vld [vmem:[%s1537_s3] sm:$0xff]  ;;  %p1175_p0 = scmp.ne.s32.totalorder %s795_s17, %s1174_s18  ;;  %p1179_p1 = scmp.lt.s32.totalorder %s795_s17, %s795_s17 }
  0x10   :  { %960 = vmatprep.subr.mxu1 %v348_v11  ;;  %v1304_v18 = vld [vmem:[%s1536_s2] ss:$0 sm:$0xff]  ;;  %p1180_p2 = scmp.lt.s32.totalorder %s1178_s19, %s1174_s18 }
  0x11   :  { %961 = vmatpush3.msra.mxu1 %v348_v11 }
  0x12   :  { %947 = vmatmul.mubr.msk.bf16.gmra.mxu1 %vm108_vm0, %v1041_v5  ;;  %962 = vmatprep.subr.mxu1 %v347_v12  ;;  %p1181_p3 = por %p1180_p2, %p1179_p1 }
  0x13   :  { %950 = vmatprep.mubr.msk.bf16.mxu1 %vm108_vm0, %v1042_v6  ;;  %963 = vmatpush3.msra.mxu1 %v347_v12 }
  0x14   :  { %964 = vmatprep.subr.mxu1 %v346_v13  ;;  %p1182_p4 = pnand %p1181_p3, %p1175_p0 }
  0x15   :  { %965 = vmatpush3.msra.mxu1 %v346_v13 }
  0x16   :  { %966 = vmatprep.subr.mxu1 %v345_v14 }
  0x17   :  { %967 = vmatpush3.msra.mxu1 %v345_v14 }
  0x18   :  { %968 = vmatprep.subr.mxu1 %v344_v15 }
  0x19   :  { %969 = vmatpush3.msra.mxu1 %v344_v15 }
  0x1a   :  { %951 = vmatmul.mubr.msk.bf16.gmra.mxu1 %vm108_vm0, %v1043_v7  ;;  %970 = vmatprep.subr.mxu1 %v343_v16 }
  0x1b   :  { %954 = vmatprep.mubr.msk.bf16.mxu1 %vm108_vm0, %v1044_v8  ;;  %971 = vmatpush3.msra.mxu1 %v343_v16 }
  0x1c   :  { %972 = vmatprep.subr.mxu1 %v342_v17 }
  0x1d   :  { %973 = vmatpush3.msra.mxu1 %v342_v17 }
  0x22   :  { %955 = vmatmul.mubr.msk.bf16.gmra.mxu1 %vm108_vm0, %v1045_v9 }
  0xca   :  { %v944_v19 = vpop.f32.mrf.mxu1 }
  0xcb   :  { %v1307_v20 = vadd.f32 %v944_v19, %v1304_v18 }
  0xcc   :  { %v167_v21 = vpop.f32.mrf.mxu1 }
  0xcd   :  { %v823_v22 = vmul.f32 -1.442695, %v1307_v20  ;;  %v1311_v23 = vadd.f32 %v1304_v18, %v167_v21 }
  0xce   :  { %v945_v24 = vpop.f32.mrf.mxu1 }
  0xcf   :  { %1046 = vpow2.f32 %v823_v22  ;;  %v821_v25 = vmul.f32 -1.442695, %v1311_v23  ;;  %v1315_v26 = vadd.f32 %v945_v24, %v1304_v18 }
  0xd0   :  { %v170_v27 = vpop.f32.mrf.mxu1 }
  0xd1   :  { %1048 = vpow2.f32 %v821_v25  ;;  %v824_v28 = vmul.f32 -1.442695, %v1315_v26  ;;  %v1319_v29 = vadd.f32 %v1304_v18, %v170_v27 }
  0xd2   :  { %v948_v30 = vpop.f32.mrf.mxu1 }
  0xd3   :  { %1050 = vpow2.f32 %v824_v28  ;;  %v822_v31 = vmul.f32 -1.442695, %v1319_v29  ;;  %v1323_v32 = vadd.f32 %v948_v30, %v1304_v18 }
  0xd4   :  { %v183_v33 = vpop.f32.mrf.mxu1 }
  0xd5   :  { %1052 = vpow2.f32 %v822_v31  ;;  %v827_v34 = vmul.f32 -1.442695, %v1323_v32  ;;  %v1327_v35 = vadd.f32 %v1304_v18, %v183_v33 }
  0xd6   :  { %v949_v36 = vpop.f32.mrf.mxu1 }
  0xd7   :  { %1054 = vpow2.f32 %v827_v34  ;;  %v825_v37 = vmul.f32 -1.442695, %v1327_v35  ;;  %v1331_v38 = vadd.f32 %v949_v36, %v1304_v18 }
  0xd8   :  { %v186_v39 = vpop.f32.mrf.mxu1 }
  0xd9   :  { %1056 = vpow2.f32 %v825_v37  ;;  %v828_v40 = vmul.f32 -1.442695, %v1331_v38  ;;  %v1335_v41 = vadd.f32 %v1304_v18, %v186_v39 }
  0xda   :  { %v952_v42 = vpop.f32.mrf.mxu1 }
  0xdb   :  { %1058 = vpow2.f32 %v828_v40  ;;  %v826_v43 = vmul.f32 -1.442695, %v1335_v41  ;;  %v1339_v44 = vadd.f32 %v952_v42, %v1304_v18 }
  0xdc   :  { %v1047_v45 = vpop.eup %1046  ;;  %v199_v46 = vpop.f32.mrf.mxu1 }
  0xdd   :  { %v280_v47 = vadd.f32 1.0, %v1047_v45  ;;  %1060 = vpow2.f32 %v826_v43  ;;  %v831_v48 = vmul.f32 -1.442695, %v1339_v44  ;;  %v1343_v49 = vadd.f32 %v1304_v18, %v199_v46 }
  0xde   :  { %v1049_v50 = vpop.eup %1048  ;;  %v953_v51 = vpop.f32.mrf.mxu1 }
  0xdf   :  { %1062 = vrcp.f32 %v280_v47  ;;  %v278_v52 = vadd.f32 1.0, %v1049_v50  ;;  %v829_v53 = vmul.f32 -1.442695, %v1343_v49  ;;  %v1347_v54 = vadd.f32 %v953_v51, %v1304_v18 }
  0xe0   :  { %v1051_v55 = vpop.eup %1050  ;;  %1064 = vpow2.f32 %v831_v48  ;;  %v202_v56 = vpop.f32.mrf.mxu1 }
  0xe1   :  { %1066 = vrcp.f32 %v278_v52  ;;  %v281_v57 = vadd.f32 1.0, %v1051_v55  ;;  %v832_v58 = vmul.f32 -1.442695, %v1347_v54  ;;  %v1351_v59 = vadd.f32 %v1304_v18, %v202_v56 }
  0xe2   :  { %v1053_v60 = vpop.eup %1052  ;;  %1068 = vpow2.f32 %v829_v53  ;;  %v956_v61 = vpop.f32.mrf.mxu1 }
  0xe3   :  { %1070 = vrcp.f32 %v281_v57  ;;  %v279_v62 = vadd.f32 1.0, %v1053_v60  ;;  %v830_v63 = vmul.f32 -1.442695, %v1351_v59  ;;  %v1355_v0 = vadd.f32 %v956_v61, %v1304_v18 }
  0xe4   :  { %v1055_v1 = vpop.eup %1054  ;;  %1072 = vpow2.f32 %v832_v58  ;;  %v215_v2 = vpop.f32.mrf.mxu1 }
  0xe5   :  { %1074 = vrcp.f32 %v279_v62  ;;  %v835_v3 = vmul.f32 -1.442695, %v1355_v0  ;;  %v1359_v4 = vadd.f32 %v1304_v18, %v215_v2  ;;  %v284_v7 = vadd.f32 1.0, %v1055_v1 }
  0xe6   :  { %v1057_v5 = vpop.eup %1056  ;;  %1076 = vpow2.f32 %v830_v63  ;;  %v957_v6 = vpop.f32.mrf.mxu1 }
  0xe7   :  { %v282_v8 = vadd.f32 1.0, %v1057_v5  ;;  %v833_v9 = vmul.f32 -1.442695, %v1359_v4  ;;  %v1363_v10 = vadd.f32 %v957_v6, %v1304_v18  ;;  %1078 = vpow2.f32 %v835_v3 }
  0xe8   :  { %v1059_v11 = vpop.eup %1058  ;;  %v218_v12 = vpop.f32.mrf.mxu1 }
  0xe9   :  { %1080 = vrcp.f32 %v282_v8  ;;  %v836_v13 = vmul.f32 -1.442695, %v1363_v10  ;;  %v1367_v14 = vadd.f32 %v1304_v18, %v218_v12  ;;  %v285_v16 = vadd.f32 1.0, %v1059_v11 }
  0xea   :  { %v1061_v15 = vpop.eup %1060  ;;  %1082 = vpow2.f32 %v833_v9 }
  0xeb   :  { %1084 = vrcp.f32 %v284_v7  ;;  %v283_v17 = vadd.f32 1.0, %v1061_v15  ;;  %v834_v19 = vmul.f32 -1.442695, %v1367_v14 }
  0xec   :  { %v1063_v21 = vpop.eup %1062  ;;  %1086 = vpow2.f32 %v836_v13 }
  0xed   :  { %v1065_v22 = vpop.eup %1064  ;;  %1088 = vrcp.f32 %v283_v17  ;;  %v328_v37 = vmul.f32 %v1063_v21, %v1307_v20  ;;  %v1415_v17 = vld [vmem:[%s1538_s4] ss:$0 sm:$0xff] }
  0xee   :  { %v1067_v24 = vpop.eup %1066  ;;  %1090 = vpow2.f32 %v834_v19  ;;  %v288_v31 = vadd.f32 1.0, %v1065_v22 }
  0xef   :  { %v1069_v25 = vpop.eup %1068  ;;  %v326_v27 = vmul.f32 %v1067_v24, %v1311_v23  ;;  %1092 = vrcp.f32 %v285_v16 }
  0xf0   :  { %v1071_v18 = vpop.eup %1070  ;;  %v286_v28 = vadd.f32 1.0, %v1069_v25 }
  0xf1   :  { %v1073_v30 = vpop.eup %1072  ;;  %974 = vmatprep.mubr.msk.f32.mxu1 %vm357_vm1, %v326_v27  ;;  %v329_v45 = vmul.f32 %v1071_v18, %v1315_v26 }
  0xf2   :  { %v1075_v33 = vpop.eup %1074  ;;  %1094 = vrcp.f32 %v286_v28  ;;  %v289_v39 = vadd.f32 1.0, %v1073_v30 }
  0xf3   :  { %v1077_v34 = vpop.eup %1076  ;;  %v327_v36 = vmul.f32 %v1075_v33, %v1319_v29  ;;  %1096 = vrcp.f32 %v288_v31 }
  0xf4   :  { %v287_v40 = vadd.f32 1.0, %v1077_v34  ;;  %v1079_v42 = vpop.eup %1078 }
  0xf5   :  { %975 = vmatmul.mubr.msk.f32.vlgmr.msra.gmra.mxu1 %vm357_vm1, %v327_v36  ;;  %v292_v20 = vadd.f32 1.0, %v1079_v42 }
  0xf6   :  { %v1081_v23 = vpop.eup %1080  ;;  %1098 = vrcp.f32 %v287_v40  ;;  %977 = vmatprep.mubr.msk.f32.mxu1 %vm357_vm1, %v328_v37 }
  0xf7   :  { %v1083_v43 = vpop.eup %1082  ;;  %v330_v46 = vmul.f32 %v1081_v23, %v1327_v35  ;;  %1100 = vrcp.f32 %v289_v39 }
  0xf8   :  { %v1085_v47 = vpop.eup %1084  ;;  %v290_v29 = vadd.f32 1.0, %v1083_v43 }
  0xf9   :  { %v1087_v48 = vpop.eup %1086  ;;  %978 = vmatmul.mubr.msk.f32.gmra.mxu1 %vm357_vm1, %v329_v45  ;;  %v332_v55 = vmul.f32 %v1085_v47, %v1323_v32 }
  0xfa   :  { %v1089_v50 = vpop.eup %1088  ;;  %1102 = vrcp.f32 %v290_v29  ;;  %980 = vmatprep.mubr.msk.f32.mxu1 %vm357_vm1, %v330_v46  ;;  %v293_v26 = vadd.f32 1.0, %v1087_v48 }
  0xfb   :  { %v1091_v51 = vpop.eup %1090  ;;  %v331_v52 = vmul.f32 %v1089_v50, %v1335_v41  ;;  %1104 = vrcp.f32 %v292_v20 }
  0xfc   :  { %v1093_v53 = vpop.eup %1092  ;;  %v291_v56 = vadd.f32 1.0, %v1091_v51 }
  0xfd   :  { %981 = vmatmul.mubr.msk.f32.gmra.mxu1 %vm357_vm1, %v331_v52  ;;  %v333_v57 = vmul.f32 %v1093_v53, %v1331_v38 }
  0xfe   :  { %1106 = vrcp.f32 %v291_v56  ;;  %983 = vmatprep.mubr.msk.f32.mxu1 %vm357_vm1, %v332_v55 }
  0xff   :  { %v1095_v35 = vpop.eup %1094  ;;  %1108 = vrcp.f32 %v293_v26 }
 0x100   :  { %v334_v58 = vmul.f32 %v1095_v35, %v1343_v49  ;;  %v1097_v41 = vpop.eup %1096 }
 0x101   :  { %984 = vmatmul.mubr.msk.f32.gmra.mxu1 %vm357_vm1, %v333_v57  ;;  %v336_v62 = vmul.f32 %v1097_v41, %v1339_v44 }
 0x102   :  { %986 = vmatprep.mubr.msk.f32.mxu1 %vm357_vm1, %v334_v58 }
 0x103   :  { %v1099_v32 = vpop.eup %1098 }
 0x104   :  { %v335_v60 = vmul.f32 %v1099_v32, %v1351_v59  ;;  %v1101_v61 = vpop.eup %1100 }
 0x105   :  { %v337_v38 = vmul.f32 %v1101_v61, %v1347_v54  ;;  %v1196_v54 = vmov 0.0  }
 0x106   :  { %987 = vmatmul.mubr.msk.f32.gmra.mxu1 %vm357_vm1, %v335_v60  ;;  %998 = vmatprep.subr.mxu0 %v1196_v54 }
 0x107   :  { %v1103_v63 = vpop.eup %1102  ;;  %989 = vmatprep.mubr.msk.f32.mxu1 %vm357_vm1, %v336_v62  ;;  %1030 = vmatprep.mubr.msk.f32.mxu0 %vm1197_vm2, %v1196_v54 }
 0x108   :  { %v338_v49 = vmul.f32 %v1103_v63, %v1359_v4  ;;  %v1105_v1 = vpop.eup %1104 }
 0x109   :  { %v340_v44 = vmul.f32 %v1105_v1, %v1355_v0 }
 0x10a   :  { %990 = vmatmul.mubr.msk.f32.gmra.mxu1 %vm357_vm1, %v337_v38 }
 0x10b   :  { %v1107_v2 = vpop.eup %1106  ;;  %992 = vmatprep.mubr.msk.f32.mxu1 %vm357_vm1, %v338_v49 }
 0x10c   :  { %v339_v59 = vmul.f32 %v1107_v2, %v1367_v14  ;;  %v1109_v3 = vpop.eup %1108 }
 0x10d   :  { %v341_v5 = vmul.f32 %v1109_v3, %v1363_v10 }
 0x10e   :  { %993 = vmatmul.mubr.msk.f32.gmra.mxu1 %vm357_vm1, %v339_v59 }
 0x10f   :  { %995 = vmatprep.mubr.msk.f32.mxu1 %vm357_vm1, %v340_v44 }
 0x112   :  { %996 = vmatmul.mubr.msk.f32.gmra.mxu1 %vm357_vm1, %v341_v5 }
 0x1b5   :  { %v1404_v4 = vpop.f32.mrf.mxu1 }
 0x1b7   :  { %v1406_v6 = vpop.f32.mrf.mxu1 }
 0x1b9   :  { %v1408_v7 = vpop.f32.mrf.mxu1 }
 0x1ba   :  { %v1461_v49 = vadd.f32 %v1408_v7, %v1415_v17 }
 0x1bb   :  { %v1410_v0 = vpop.f32.mrf.mxu1 }
 0x1bc   :  { %v857_v5 = vmul.f32 -1.442695, %v1461_v49 }
 0x1bd   :  { %v982_v8 = vpop.f32.mrf.mxu1 }
 0x1be   :  { %v1451_v56 = vadd.f32 %v982_v8, %v1415_v17  ;;  %v1469_v8 = vadd.f32 %v1415_v17, %v1410_v0 }
 0x1bf   :  { %v492_v9 = vpop.f32.mrf.mxu1 }
 0x1c0   :  { %v859_v32 = vmul.f32 -1.442695, %v1451_v56  ;;  %v1456_v60 = vadd.f32 %v1415_v17, %v492_v9 }
 0x1c1   :  { %v985_v11 = vpop.f32.mrf.mxu1 }
 0x1c2   :  { %v1443_v48 = vadd.f32 %v985_v11, %v1415_v17  ;;  %v858_v1 = vmul.f32 -1.442695, %v1456_v60 }
 0x1c3   :  { %v502_v10 = vpop.f32.mrf.mxu1 }
 0x1c4   :  { %v861_v52 = vmul.f32 -1.442695, %v1443_v48  ;;  %v1448_v53 = vadd.f32 %v1415_v17, %v502_v10 }
 0x1c6   :  { %v988_v12 = vpop.f32.mrf.mxu1  ;;  %v860_v35 = vmul.f32 -1.442695, %v1448_v53 }
 0x1c7   :  { %v1435_v39 = vadd.f32 %v988_v12, %v1415_v17  ;;  %v1476_v12 = vadd.f32 %v1404_v4, %v1415_v17 }
 0x1c8   :  { %v512_v13 = vpop.f32.mrf.mxu1 }
 0x1c9   :  { %v863_v23 = vmul.f32 -1.442695, %v1435_v39  ;;  %v1440_v43 = vadd.f32 %v1415_v17, %v512_v13  ;;  %v856_v13 = vmul.f32 -1.442695, %v1469_v8 }
 0x1ca   :  { %v991_v14 = vpop.f32.mrf.mxu1 }
 0x1cb   :  { %v1427_v33 = vadd.f32 %v991_v14, %v1415_v17  ;;  %v862_v20 = vmul.f32 -1.442695, %v1440_v43 }
 0x1cc   :  { %v522_v15 = vpop.f32.mrf.mxu1 }
 0x1cd   :  { %v865_v36 = vmul.f32 -1.442695, %v1427_v33  ;;  %v1432_v37 = vadd.f32 %v1415_v17, %v522_v15 }
 0x1ce   :  { %v994_v16 = vpop.f32.mrf.mxu1 }
 0x1cf   :  { %v1418_v19 = vadd.f32 %v994_v16, %v1415_v17  ;;  %v864_v40 = vmul.f32 -1.442695, %v1432_v37 }
 0x1d0   :  { %v532_v21 = vpop.f32.mrf.mxu1 }
 0x1d1   :  { %v867_v25 = vmul.f32 -1.442695, %v1418_v19  ;;  %v1423_v18 = vadd.f32 %v1415_v17, %v532_v21  ;;  %v1485_v21 = vadd.f32 %v1415_v17, %v1406_v6 }
 0x1d2   :  { %v997_v22 = vpop.f32.mrf.mxu1 }
 0x1d3   :  { %v548_v24 = vadd.f32 %v997_v22, %v1415_v17  ;;  %v866_v34 = vmul.f32 -1.442695, %v1423_v18 }
 0x1d4   :  { %v542_v27 = vpop.f32.mrf.mxu1 }
 0x1d5   :  { %v869_v28 = vmul.f32 -1.442695, %v548_v24  ;;  %v543_v30 = vadd.f32 %v1415_v17, %v542_v27  ;;  %v854_v27 = vmul.f32 -1.442695, %v1485_v21 }
 0x1d7   :  { %1110 = vpow2.f32 %v869_v28  ;;  %v868_v31 = vmul.f32 -1.442695, %v543_v30 }
 0x1d8   :  { %1112 = vpow2.f32 %v867_v25 }
 0x1d9   :  { %1114 = vpow2.f32 %v868_v31 }
 0x1da   :  { %1116 = vpow2.f32 %v866_v34 }
 0x1db   :  { %1118 = vpow2.f32 %v865_v36 }
 0x1dc   :  { %1120 = vpow2.f32 %v864_v40 }
 0x1e4   :  { %v1111_v42 = vpop.eup %1110 }
 0x1e5   :  { %v1113_v45 = vpop.eup %1112  ;;  %v614_v46 = vadd.f32 1.0, %v1111_v42 }
 0x1e6   :  { %v1115_v47 = vpop.eup %1114  ;;  %v612_v50 = vadd.f32 1.0, %v1113_v45 }
 0x1e7   :  { %1122 = vrcp.f32 %v614_v46  ;;  %v613_v29 = vadd.f32 1.0, %v1115_v47  ;;  %v1117_v51 = vpop.eup %1116 }
 0x1e8   :  { %1124 = vpow2.f32 %v863_v23  ;;  %v611_v55 = vadd.f32 1.0, %v1117_v51  ;;  %v1119_v26 = vpop.eup %1118 }
 0x1e9   :  { %1126 = vrcp.f32 %v613_v29  ;;  %v610_v57 = vadd.f32 1.0, %v1119_v26  ;;  %v1121_v58 = vpop.eup %1120 }
 0x1ea   :  { %1128 = vpow2.f32 %v862_v20  ;;  %v609_v62 = vadd.f32 1.0, %v1121_v58 }
 0x1eb   :  { %1130 = vrcp.f32 %v612_v50 }
 0x1ec   :  { %1132 = vpow2.f32 %v861_v52 }
 0x1ed   :  { %1134 = vrcp.f32 %v611_v55 }
 0x1ee   :  { %1136 = vpow2.f32 %v860_v35 }
 0x1ef   :  { %1138 = vrcp.f32 %v610_v57 }
 0x1f0   :  { %1140 = vpow2.f32 %v859_v32  ;;  %v663_v32 = vld [vmem:[%s1539_s5] sm:$0x1] }
 0x1f1   :  { %1142 = vrcp.f32 %v609_v62 }
 0x1f2   :  { %1144 = vpow2.f32 %v858_v1 }
 0x1f4   :  { %v1123_v41 = vpop.eup %1122 }
 0x1f5   :  { %v1125_v61 = vpop.eup %1124  ;;  %v662_v63 = vmul.f32 %v1123_v41, %v548_v24 }
 0x1f6   :  { %v1127_v38 = vpop.eup %1126  ;;  %v608_v59 = vadd.f32 1.0, %v1125_v61 }
 0x1f7   :  { %999 = vmatpush3.xpose.msk.msra.mxu0 %vm108_vm0, %v662_v63  ;;  %v1129_v2 = vpop.eup %1128  ;;  %v661_v3 = vmul.f32 %v1127_v38, %v543_v30 }
 0x1f8   :  { %1000 = vmatprep.subr.mxu0 %v1196_v54  ;;  %v1131_v44 = vpop.eup %1130  ;;  %1146 = vrcp.f32 %v608_v59  ;;  %v607_v9 = vadd.f32 1.0, %v1129_v2 }
 0x1f9   :  { %v1133_v7 = vpop.eup %1132  ;;  %v660_v11 = vmul.f32 %v1131_v44, %v1418_v19  ;;  %1148 = vpow2.f32 %v857_v5  ;;  %v855_v19 = vmul.f32 -1.442695, %v1476_v12 }
 0x1fa   :  { %v1135_v10 = vpop.eup %1134  ;;  %v606_v14 = vadd.f32 1.0, %v1133_v7  ;;  %1150 = vrcp.f32 %v607_v9 }
 0x1fb   :  { %1001 = vmatpush3.xpose.msk.msra.mxu0 %vm108_vm0, %v661_v3  ;;  %v1137_v0 = vpop.eup %1136  ;;  %v659_v15 = vmul.f32 %v1135_v10, %v1423_v18  ;;  %1152 = vpow2.f32 %v856_v13 }
 0x1fc   :  { %1002 = vmatprep.subr.mxu0 %v1196_v54  ;;  %v1139_v16 = vpop.eup %1138  ;;  %1154 = vrcp.f32 %v606_v14  ;;  %v605_v22 = vadd.f32 1.0, %v1137_v0 }
 0x1fd   :  { %v1141_v4 = vpop.eup %1140  ;;  %v658_v24 = vmul.f32 %v1139_v16, %v1427_v33  ;;  %1156 = vpow2.f32 %v855_v19 }
 0x1fe   :  { %v1143_v25 = vpop.eup %1142  ;;  %v604_v28 = vadd.f32 1.0, %v1141_v4  ;;  %1158 = vrcp.f32 %v605_v22 }
 0x1ff   :  { %1003 = vmatpush3.xpose.msk.msra.mxu0 %vm108_vm0, %v660_v11  ;;  %v1145_v18 = vpop.eup %1144  ;;  %v657_v6 = vmul.f32 %v1143_v25, %v1432_v37  ;;  %1160 = vpow2.f32 %v854_v27 }
 0x200   :  { %1004 = vmatprep.subr.mxu0 %v1196_v54  ;;  %1162 = vrcp.f32 %v604_v28  ;;  %v603_v31 = vadd.f32 1.0, %v1145_v18 }
 0x202   :  { %1164 = vrcp.f32 %v603_v31 }
 0x203   :  { %1005 = vmatpush3.xpose.msk.msra.mxu0 %vm108_vm0, %v659_v15 }
 0x204   :  { %1006 = vmatprep.subr.mxu0 %v1196_v54 }
 0x205   :  { %v1147_v17 = vpop.eup %1146 }
 0x206   :  { %v1149_v30 = vpop.eup %1148  ;;  %v656_v33 = vmul.f32 %v1147_v17, %v1435_v39 }
 0x207   :  { %1007 = vmatpush3.xpose.msk.msra.mxu0 %vm108_vm0, %v658_v24  ;;  %v1151_v34 = vpop.eup %1150  ;;  %v602_v40 = vadd.f32 1.0, %v1149_v30 }
 0x208   :  { %1008 = vmatprep.subr.mxu0 %v1196_v54  ;;  %v1153_v36 = vpop.eup %1152  ;;  %v655_v37 = vmul.f32 %v1151_v34, %v1440_v43 }
 0x209   :  { %v1155_v42 = vpop.eup %1154  ;;  %1166 = vrcp.f32 %v602_v40  ;;  %v601_v45 = vadd.f32 1.0, %v1153_v36 }
 0x20a   :  { %v1157_v23 = vpop.eup %1156  ;;  %v654_v39 = vmul.f32 %v1155_v42, %v1443_v48 }
 0x20b   :  { %1009 = vmatpush3.xpose.msk.msra.mxu0 %vm108_vm0, %v657_v6  ;;  %v1159_v46 = vpop.eup %1158  ;;  %v600_v29 = vadd.f32 1.0, %v1157_v23  ;;  %1168 = vrcp.f32 %v601_v45 }
 0x20c   :  { %1010 = vmatprep.subr.mxu0 %v1196_v54  ;;  %v1161_v47 = vpop.eup %1160  ;;  %v653_v43 = vmul.f32 %v1159_v46, %v1448_v53 }
 0x20d   :  { %v1163_v20 = vpop.eup %1162  ;;  %1170 = vrcp.f32 %v600_v29  ;;  %v599_v50 = vadd.f32 1.0, %v1161_v47 }
 0x20e   :  { %v652_v51 = vmul.f32 %v1163_v20, %v1451_v56 }
 0x20f   :  { %1011 = vmatpush3.xpose.msk.msra.mxu0 %vm108_vm0, %v656_v33  ;;  %v1165_v48 = vpop.eup %1164  ;;  %1172 = vrcp.f32 %v599_v50 }
 0x210   :  { %1012 = vmatprep.subr.mxu0 %v1196_v54  ;;  %v651_v52 = vmul.f32 %v1165_v48, %v1456_v60  ;;  %v665_v60 = vstv %s1540_s6 }
 0x213   :  { %1013 = vmatpush3.xpose.msk.msra.mxu0 %vm108_vm0, %v655_v37 }
 0x214   :  { %1014 = vmatprep.subr.mxu0 %v1196_v54 }
 0x216   :  { %v1167_v55 = vpop.eup %1166 }
 0x217   :  { %1015 = vmatpush3.xpose.msk.msra.mxu0 %vm108_vm0, %v654_v39  ;;  %v650_v53 = vmul.f32 %v1167_v55, %v1461_v49 }
 0x218   :  { %1016 = vmatprep.subr.mxu0 %v1196_v54  ;;  %v1169_v26 = vpop.eup %1168 }
 0x219   :  { %v649_v56 = vmul.f32 %v1169_v26, %v1469_v8 }
 0x21a   :  { %v1171_v35 = vpop.eup %1170 }
 0x21b   :  { %1017 = vmatpush3.xpose.msk.msra.mxu0 %vm108_vm0, %v653_v43  ;;  %v648_v57 = vmul.f32 %v1171_v35, %v1476_v12 }
 0x21c   :  { %1018 = vmatprep.subr.mxu0 %v1196_v54  ;;  %v1173_v58 = vpop.eup %1172 }
 0x21d   :  { %v647_v41 = vmul.f32 %v1173_v58, %v1485_v21 }
 0x21f   :  { %1019 = vmatpush3.xpose.msk.msra.mxu0 %vm108_vm0, %v652_v51 }
 0x220   :  { %1020 = vmatprep.subr.mxu0 %v1196_v54 }
 0x223   :  { %1021 = vmatpush3.xpose.msk.msra.mxu0 %vm108_vm0, %v651_v52 }
 0x224   :  { %1022 = vmatprep.subr.mxu0 %v1196_v54 }
 0x227   :  { %1023 = vmatpush3.xpose.msk.msra.mxu0 %vm108_vm0, %v650_v53 }
 0x228   :  { %1024 = vmatprep.subr.mxu0 %v1196_v54 }
 0x22b   :  { %1025 = vmatpush3.xpose.msk.msra.mxu0 %vm108_vm0, %v649_v56 }
 0x22c   :  { %1026 = vmatprep.subr.mxu0 %v1196_v54 }
 0x22f   :  { %1027 = vmatpush3.xpose.msk.msra.mxu0 %vm108_vm0, %v648_v57 }
 0x230   :  { %1028 = vmatprep.subr.mxu0 %v1196_v54 }
 0x233   :  { %1029 = vmatpush3.xpose.msk.msra.mxu0 %vm108_vm0, %v647_v41 }
 0x236   :  { %1031 = vmatmul.mubr.msk.f32.vlgmr.msra.gmra.mxu0 %vm108_vm0, %v663_v32 }
 0x2f6   :  { %v783_v61 = vpop.f32.mrf.mxu0 }
 0x2f7   :  { %v784_v62 = vadd.f32 %v783_v61, %v665_v60 }
 0x2f8   :  { %v1032_v54 = vpop.f32.mrf.mxu0 }
 0x2f9   :  { %787 = vst [vmem:[#allocation3] sm:$0x1] %v784_v62 }
 0x2fa   :  { %1185 = shalt.err (!%p1182_p4)
}
 0x2fb   :  { %797 = dma.vmem_to_hbm [thread:$0]  %s795_s17, 16, %s1541_s7, [#allocation4]  }
 0x2fc   :  { %1194 = dma.done.wait [#allocation4], 16  }
 0x2fd   :  { %1195 = vsyncadd [#allocation4], 4294967280 }
 0x2fe   :  { %801 = vsyncpa [#allocation4], 1 }

</bundles_post_ra>
